<compile_context>
chip_gen: v5e
topology: v5e:2x2
jax: 0.10.0
libtpu: 0.0.40
codegen_flags: <defaults>
</compile_context>

<pallas_src>
import functools

import jax
import jax.numpy as jnp
from jax.experimental import pallas as pl
from jax.experimental.pallas import tpu as pltpu

LANE = 128
ROW_ALIGN = 16        # multiple of 8; keeps bf16 sublane packing happy
MIN_TILE_ROWS = 512   # floor when splitting large batches for >=4 grid steps


def _round_up(n, m):
    return (n + m - 1) // m * m


def _eepose_mlp_kernel(x_ref, w1_ref, b1_ref, w2_ref, b2_ref, w3_ref, b3_ref,
                       o_ref, *, compute_dtype):
    # x arrives in f32 (avoids a wrapper-side HBM cast pass); cast to MXU dtype here.
    x = x_ref[...].astype(compute_dtype)

    # Linear(7 -> 32 [lane-padded to 128]) + ReLU  (f32 accumulate / elementwise)
    h = jnp.dot(x, w1_ref[...], preferred_element_type=jnp.float32)
    h = jnp.maximum(h + b1_ref[...], 0.0).astype(compute_dtype)

    # Linear(32 -> 64 [padded 128x128]) + ReLU
    h = jnp.dot(h, w2_ref[...], preferred_element_type=jnp.float32)
    h = jnp.maximum(h + b2_ref[...], 0.0).astype(compute_dtype)

    # Linear(64 -> 128) -- no activation on the head
    o = jnp.dot(h, w3_ref[...], preferred_element_type=jnp.float32)
    o_ref[...] = (o + b3_ref[...]).astype(o_ref.dtype)


def ee_pose_encoder_forward(eepose, params, *, compute_dtype=jnp.bfloat16,
                            out_dtype=None, block_rows=8192):
    """eepose: (a, b, proprio_dim). params: [(W1,b1),(W2,b2),(W3,b3)] with W stored
    (in_features, out_features) so the kernel computes x @ W + b (== PyTorch's
    x @ W_torch.T + b). Returns (a, b * 128) like the module's forward().
    out_dtype defaults to compute_dtype (bf16); pass jnp.float32 if downstream
    consumers need full-precision outputs."""
    if out_dtype is None:
        out_dtype = compute_dtype  # bf16 output halves the dominant HBM write
    (w1, b1), (w2, b2), (w3, b3) = params
    a, b, c = eepose.shape
    in_dim = w1.shape[0]
    assert c == in_dim, (c, in_dim)
    d1, d2, out_dim = w1.shape[1], w2.shape[1], w3.shape[1]

    n = a * b
    # Keep x in f32 (module casts input to param dtype); bf16 cast happens on-chip.
    x2d = eepose.reshape(n, c).astype(jnp.float32)

    # --- pad hidden widths to the 128-lane vreg width (numerically exact) ----
    h1 = _round_up(d1, LANE)        # 32  -> 128
    h2 = _round_up(d2, LANE)        # 64  -> 128
    od = _round_up(out_dim, LANE)   # 128 -> 128

    def pad_w(w, rows, cols):
        buf = jnp.zeros((rows, cols), jnp.float32)
        return buf.at[:w.shape[0], :w.shape[1]].set(w.astype(jnp.float32))

    def pad_b(bv, cols):
        v = bv.reshape(-1).astype(jnp.float32)
        buf = jnp.zeros((1, cols), jnp.float32)
        return buf.at[0, :v.shape[0]].set(v)

    w1p = pad_w(w1, in_dim, h1).astype(compute_dtype)
    w2p = pad_w(w2, h1, h2).astype(compute_dtype)
    w3p = pad_w(w3, h2, od).astype(compute_dtype)
    b1p = pad_b(b1, h1)
    b2p = pad_b(b2, h2)
    b3p = pad_b(b3, od)

    # --- row tiling -----------------------------------------------------------
    # Big tiles amortize the ~0.35 us per-grid-step overhead; cap so large batches
    # still get >= ~4 grid steps (v7x megacore can shard the "parallel" axis), and
    # never exceed the (row-aligned) batch.  Trailing partial blocks are handled by
    # Pallas boundary masking (rows are independent), so no wrapper pad/slice passes.
    tile_b = _round_up(block_rows, ROW_ALIGN)
    tile_b = min(tile_b, max(_round_up(pl.cdiv(n, 4), ROW_ALIGN), MIN_TILE_ROWS))
    tile_b = min(tile_b, _round_up(n, ROW_ALIGN))
    grid = (pl.cdiv(n, tile_b),)

    # VMEM budget: the (tile_b, 7) x block is lane-padded to 128 in VMEM (~512 B/row
    # f32), output block od*itemsize/row, both double-buffered, plus f32/bf16 temps.
    out_itemsize = jnp.dtype(out_dtype).itemsize
    per_row_vmem = 2 * LANE * 4 + 2 * od * out_itemsize + 6 * LANE
    vmem_limit = int(min(56 << 20, max(32 << 20, tile_b * per_row_vmem + (2 << 20))))

    # advisory cost hint (real, unpadded math)
    flops = 2 * n * (in_dim * d1 + d1 * d2 + d2 * out_dim)
    w_itemsize = jnp.dtype(compute_dtype).itemsize
    bytes_accessed = (x2d.size * 4
                      + n * out_dim * out_itemsize
                      + (w1p.size + w2p.size + w3p.size) * w_itemsize
                      + (b1p.size + b2p.size + b3p.size) * 4)
    cost = pl.CostEstimate(flops=int(flops), transcendentals=0,
                           bytes_accessed=int(bytes_accessed))

    kernel = functools.partial(_eepose_mlp_kernel, compute_dtype=compute_dtype)

    out2d = pl.pallas_call(
        kernel,
        out_shape=jax.ShapeDtypeStruct((n, od), out_dtype),
        grid=grid,
        in_specs=[
            pl.BlockSpec((tile_b, c), lambda i: (i, 0)),    # x rows: tiled
            pl.BlockSpec((in_dim, h1), lambda i: (0, 0)),   # weights/biases:
            pl.BlockSpec((1, h1), lambda i: (0, 0)),        #   resident blocks
            pl.BlockSpec((h1, h2), lambda i: (0, 0)),
            pl.BlockSpec((1, h2), lambda i: (0, 0)),
            pl.BlockSpec((h2, od), lambda i: (0, 0)),
            pl.BlockSpec((1, od), lambda i: (0, 0)),
        ],
        out_specs=pl.BlockSpec((tile_b, od), lambda i: (i, 0)),
        compiler_params=pltpu.CompilerParams(
            dimension_semantics=("parallel",),
            vmem_limit_bytes=vmem_limit),
        cost_estimate=cost,
    )(x2d, w1p, b1p, w2p, b2p, w3p, b3p)

    if od != out_dim:
        out2d = out2d[:, :out_dim]
    return out2d.reshape(a, b * out_dim)    # reshape(a, b*c) as in forward()


def init_params(key, proprio_dim=7):
    """Deterministic PyTorch-Linear-style uniform init; W stored (in, out)."""
    dims = [proprio_dim, 32, 64, 128]
    params = []
    for i in range(len(dims) - 1):
        key, kw, kb = jax.random.split(key, 3)
        bound = 1.0 / (dims[i] ** 0.5)
        w = jax.random.uniform(kw, (dims[i], dims[i + 1]), jnp.float32,
                               -bound, bound)
        bias = jax.random.uniform(kb, (dims[i + 1],), jnp.float32,
                                  -bound, bound)
        params.append((w, bias))
    return params


if __name__ == "__main__":
    key = jax.random.PRNGKey(0)
    proprio_dim = 7
    a, b = 2, 8                       # (batch, seq) of ee-poses

    kparams, kx = jax.random.split(key)
    params = init_params(kparams, proprio_dim)
    eepose = jax.random.normal(kx, (a, b, proprio_dim), dtype=jnp.float32)

    out = ee_pose_encoder_forward(eepose, params, compute_dtype=jnp.bfloat16)
    out = jax.block_until_ready(out)

    assert out.shape == (a, b * 128), out.shape
    out_f32 = out.astype(jnp.float32)

    # Reference 1: identical dtype path (bf16 operands, f32 accumulation, bf16 out).
    x2d = eepose.reshape(a * b, proprio_dim)
    h = x2d
    for li, (w, bias) in enumerate(params):
        h = jnp.dot(h.astype(jnp.bfloat16), w.astype(jnp.bfloat16),
                    preferred_element_type=jnp.float32) + bias
        if li < 2:
            h = jnp.maximum(h, 0.0)
    ref_bf16 = h.astype(jnp.bfloat16).astype(jnp.float32).reshape(a, b * 128)
    max_err = float(jnp.max(jnp.abs(out_f32 - ref_bf16)))
    assert jnp.allclose(out_f32, ref_bf16, atol=2e-2, rtol=2e-2), max_err

    # Reference 2: full-f32 math (sanity check on bf16 rounding error).
    hf = x2d
    for li, (w, bias) in enumerate(params):
        hf = hf @ w + bias
        if li < 2:
            hf = jnp.maximum(hf, 0.0)
    ref_f32 = hf.reshape(a, b * 128)
    assert jnp.allclose(out_f32, ref_f32, atol=8e-2, rtol=8e-2)

    print("KERNEL_OK")
</pallas_src>

<mosaic_0001>
module attributes {stable_mosaic.version = 11 : i64} {
  func.func @_eepose_mlp_kernel(%arg0: i32, %arg1: memref<16x7xf32, #tpu.memory_space<vmem>>, %arg2: memref<7x128xbf16, #tpu.memory_space<vmem>>, %arg3: memref<1x128xf32, #tpu.memory_space<vmem>>, %arg4: memref<128x128xbf16, #tpu.memory_space<vmem>>, %arg5: memref<1x128xf32, #tpu.memory_space<vmem>>, %arg6: memref<128x128xbf16, #tpu.memory_space<vmem>>, %arg7: memref<1x128xf32, #tpu.memory_space<vmem>>, %arg8: memref<16x128xbf16, #tpu.memory_space<vmem>>) attributes {dimension_semantics = [#tpu.dimension_semantics<parallel>], iteration_bounds = array<i64: 1>, scalar_prefetch = 0 : i64, scratch_operands = 0 : i64, tpu.core_type = #tpu.core_type<tc>, window_params = [{transform_indices = @transform_0, window_bounds = array<i64: 16, 7>}, {pipeline_mode = #tpu.pipeline_mode<synchronous>, transform_indices = @transform_1, window_bounds = array<i64: 7, 128>}, {pipeline_mode = #tpu.pipeline_mode<synchronous>, transform_indices = @transform_2, window_bounds = array<i64: 1, 128>}, {pipeline_mode = #tpu.pipeline_mode<synchronous>, transform_indices = @transform_3, window_bounds = array<i64: 128, 128>}, {pipeline_mode = #tpu.pipeline_mode<synchronous>, transform_indices = @transform_4, window_bounds = array<i64: 1, 128>}, {pipeline_mode = #tpu.pipeline_mode<synchronous>, transform_indices = @transform_5, window_bounds = array<i64: 128, 128>}, {pipeline_mode = #tpu.pipeline_mode<synchronous>, transform_indices = @transform_6, window_bounds = array<i64: 1, 128>}, {transform_indices = @transform_7, window_bounds = array<i64: 16, 128>}]} {
    %c0 = arith.constant 0 : index
    %c0_0 = arith.constant 0 : index
    %0 = vector.load %arg1[%c0, %c0_0] : memref<16x7xf32, #tpu.memory_space<vmem>>, vector<16x7xf32>
    %1 = arith.truncf %0 : vector<16x7xf32> to vector<16x7xbf16>
    %c0_1 = arith.constant 0 : index
    %c0_2 = arith.constant 0 : index
    %2 = vector.load %arg2[%c0_1, %c0_2] : memref<7x128xbf16, #tpu.memory_space<vmem>>, vector<7x128xbf16>
    %cst = arith.constant dense<0.000000e+00> : vector<16x128xf32>
    %3 = tpu.matmul %1, %2, %cst {dimension_numbers = #tpu.dot_dimension_numbers<[1], [0], [0], [1], [0, 0, 1, 1], [], []>} : vector<16x7xbf16>, vector<7x128xbf16>, vector<16x128xf32> -> vector<16x128xf32>
    %c0_3 = arith.constant 0 : index
    %c0_4 = arith.constant 0 : index
    %4 = vector.load %arg3[%c0_3, %c0_4] : memref<1x128xf32, #tpu.memory_space<vmem>>, vector<1x128xf32>
    %5 = vector.broadcast %4 : vector<1x128xf32> to vector<16x128xf32>
    %6 = arith.addf %3, %5 : vector<16x128xf32>
    %cst_5 = arith.constant 0.000000e+00 : f32
    %7 = vector.broadcast %cst_5 : f32 to vector<16x128xf32>
    %8 = arith.maximumf %6, %7 : vector<16x128xf32>
    %9 = arith.truncf %8 : vector<16x128xf32> to vector<16x128xbf16>
    %c0_6 = arith.constant 0 : index
    %c0_7 = arith.constant 0 : index
    %10 = vector.load %arg4[%c0_6, %c0_7] : memref<128x128xbf16, #tpu.memory_space<vmem>>, vector<128x128xbf16>
    %cst_8 = arith.constant dense<0.000000e+00> : vector<16x128xf32>
    %11 = tpu.matmul %9, %10, %cst_8 {dimension_numbers = #tpu.dot_dimension_numbers<[1], [0], [0], [1], [0, 0, 1, 1], [], []>} : vector<16x128xbf16>, vector<128x128xbf16>, vector<16x128xf32> -> vector<16x128xf32>
    %c0_9 = arith.constant 0 : index
    %c0_10 = arith.constant 0 : index
    %12 = vector.load %arg5[%c0_9, %c0_10] : memref<1x128xf32, #tpu.memory_space<vmem>>, vector<1x128xf32>
    %13 = vector.broadcast %12 : vector<1x128xf32> to vector<16x128xf32>
    %14 = arith.addf %11, %13 : vector<16x128xf32>
    %cst_11 = arith.constant 0.000000e+00 : f32
    %15 = vector.broadcast %cst_11 : f32 to vector<16x128xf32>
    %16 = arith.maximumf %14, %15 : vector<16x128xf32>
    %17 = arith.truncf %16 : vector<16x128xf32> to vector<16x128xbf16>
    %c0_12 = arith.constant 0 : index
    %c0_13 = arith.constant 0 : index
    %18 = vector.load %arg6[%c0_12, %c0_13] : memref<128x128xbf16, #tpu.memory_space<vmem>>, vector<128x128xbf16>
    %cst_14 = arith.constant dense<0.000000e+00> : vector<16x128xf32>
    %19 = tpu.matmul %17, %18, %cst_14 {dimension_numbers = #tpu.dot_dimension_numbers<[1], [0], [0], [1], [0, 0, 1, 1], [], []>} : vector<16x128xbf16>, vector<128x128xbf16>, vector<16x128xf32> -> vector<16x128xf32>
    %c0_15 = arith.constant 0 : index
    %c0_16 = arith.constant 0 : index
    %20 = vector.load %arg7[%c0_15, %c0_16] : memref<1x128xf32, #tpu.memory_space<vmem>>, vector<1x128xf32>
    %21 = vector.broadcast %20 : vector<1x128xf32> to vector<16x128xf32>
    %22 = arith.addf %19, %21 : vector<16x128xf32>
    %23 = arith.truncf %22 : vector<16x128xf32> to vector<16x128xbf16>
    %c0_17 = arith.constant 0 : index
    %c0_18 = arith.constant 0 : index
    %24 = vector.load %arg8[%c0_17, %c0_18] : memref<16x128xbf16, #tpu.memory_space<vmem>>, vector<16x128xbf16>
    tpu.vector_store %arg8[%c0_17, %c0_18], %23 {strides = array<i32>} : memref<16x128xbf16, #tpu.memory_space<vmem>>, vector<16x128xbf16>,
    return
  }
  func.func @transform_0(%arg0: i32) -> (i32, i32) {
    %c0_i32 = arith.constant 0 : i32
    %c0_i32_0 = arith.constant 0 : i32
    return %arg0, %c0_i32 : i32, i32
  }
  func.func @transform_1(%arg0: i32) -> (i32, i32) {
    %c0_i32 = arith.constant 0 : i32
    %c0_i32_0 = arith.constant 0 : i32
    %c0_i32_1 = arith.constant 0 : i32
    return %c0_i32, %c0_i32_0 : i32, i32
  }
  func.func @transform_2(%arg0: i32) -> (i32, i32) {
    %c0_i32 = arith.constant 0 : i32
    %c0_i32_0 = arith.constant 0 : i32
    %c0_i32_1 = arith.constant 0 : i32
    return %c0_i32, %c0_i32_0 : i32, i32
  }
  func.func @transform_3(%arg0: i32) -> (i32, i32) {
    %c0_i32 = arith.constant 0 : i32
    %c0_i32_0 = arith.constant 0 : i32
    %c0_i32_1 = arith.constant 0 : i32
    return %c0_i32, %c0_i32_0 : i32, i32
  }
  func.func @transform_4(%arg0: i32) -> (i32, i32) {
    %c0_i32 = arith.constant 0 : i32
    %c0_i32_0 = arith.constant 0 : i32
    %c0_i32_1 = arith.constant 0 : i32
    return %c0_i32, %c0_i32_0 : i32, i32
  }
  func.func @transform_5(%arg0: i32) -> (i32, i32) {
    %c0_i32 = arith.constant 0 : i32
    %c0_i32_0 = arith.constant 0 : i32
    %c0_i32_1 = arith.constant 0 : i32
    return %c0_i32, %c0_i32_0 : i32, i32
  }
  func.func @transform_6(%arg0: i32) -> (i32, i32) {
    %c0_i32 = arith.constant 0 : i32
    %c0_i32_0 = arith.constant 0 : i32
    %c0_i32_1 = arith.constant 0 : i32
    return %c0_i32, %c0_i32_0 : i32, i32
  }
  func.func @transform_7(%arg0: i32) -> (i32, i32) {
    %c0_i32 = arith.constant 0 : i32
    %c0_i32_0 = arith.constant 0 : i32
    return %arg0, %c0_i32 : i32, i32
  }
}

</mosaic_0001>

<bundles_post_ra>
// kernel: tpu_custom_call.1
= control target key start
LH: loop header
LB: loop body
LE: loop exit
PB: predicated region body
PF: predicated region fallthrough
CT: control target
= control target key end

     0   :  { %12 = vsyncpa [#allocation3], 0  ;;  %s542_s0 = inlined_call_operand.vmem [shape: f32[16,7], index: 0, kind: input, shape index: {}]   ;;  %s543_s1 = inlined_call_operand.vmem [shape: bf16[7,128], index: 1, kind: input, shape index: {}]   ;;  %s544_s2 = inlined_call_operand.vmem [shape: f32[1,128], index: 2, kind: input, shape index: {}]   ;;  %s545_s3 = inlined_call_operand.hbm [shape: bf16[128,128], index: 3, kind: input, shape index: {}]   ;;  %s546_s4 = inlined_call_operand.vmem [shape: f32[1,128], index: 4, kind: input, shape index: {}]   ;;  %s547_s5 = inlined_call_operand.hbm [shape: bf16[128,128], index: 5, kind: input, shape index: {}]   ;;  %s548_s6 = inlined_call_operand.vmem [shape: f32[1,128], index: 6, kind: input, shape index: {}]   ;;  %s549_s7 = inlined_call_operand.hbm [shape: bf16[16,128], index: 7, kind: output, shape index: {}]  }
   0x1   :  { %13 = vsyncpa [#allocation6], 0 }
   0x2   :  { %14 = vsyncpa [#allocation4], 0  ;;  %s25_s26 = sshll.u32 %s545_s3, 4  ;;  %s460_s27 = smov [#allocation2]   ;;  %s26_s26 = int_to_ptr.hbm [resolvable:$true] %s25_s26 }
   0x3   :  { %s27_s28 = sshll.u32 %s460_s27, 4  ;;  %s40_s8 = sshll.u32 %s547_s5, 4  ;;  %s28_s28 = int_to_ptr.vmem [resolvable:$true] %s27_s28  ;;  %s41_s8 = int_to_ptr.hbm [resolvable:$true] %s40_s8 }
   0x4   :  { %s461_s9 = smov 64   ;;  %s462_s10 = smov 4  }
   0x5   :  { %33 = dma.hbm_to_vmem [thread:$0]  %s26_s26, 1024, %s28_s28, [#allocation3], %s461_s9, %s461_s9, %s462_s10  }
   0x6   :  { %s463_s11 = smov [#allocation5]  }
   0x7   :  { %s42_s12 = sshll.u32 %s463_s11, 4  ;;  %s43_s12 = int_to_ptr.vmem [resolvable:$true] %s42_s12 }
   0x8   :  { %48 = dma.hbm_to_vmem [thread:$0]  %s41_s8, 1024, %s43_s12, [#allocation6], %s461_s9, %s461_s9, %s462_s10  }
   0x9   :  { %454 = dma.done.wait [#allocation3], 1024  }
   0xa   :  { %455 = vsyncadd [#allocation3], 4294966272 }
   0xb   :  { %456 = dma.done.wait [#allocation6], 1024  }
   0xc   :  { %457 = vsyncadd [#allocation6], 4294966272  ;;  %vm72_vm0 = vcmask 1042432   ;;  %vm73_vm1 = vcmask 1043456   ;;  %v464_v0 = vmov 65535   ;;  %v60_v4 = vld [vmem:[%s542_s0] sm:$0xff] }
   0xd   :  { %v74_v1 = vsel %vm72_vm0, 4294967295, %v464_v0  ;;  %v63_v3 = vld [vmem:[%s543_s1] sm:$0xf]  ;;  %v61_v5 = vld [vmem:[%s542_s0 + $0x8] sm:$0xff]  ;;  %v359_v7 = vld [vmem:[#allocation2 + $0x38] sm:$0xff]  ;;  %vm68_vm2 = vcmask 56320  }
   0xe   :  { %v75_v2 = vsel %vm73_vm1, %v74_v1, 0  ;;  %v62_v8 = vpack.c.bf16 %v61_v5, %v60_v4  ;;  %164 = vmatpush.bf16.msra.mxu1 %v359_v7  ;;  %v358_v9 = vld [vmem:[#allocation2 + $0x30] sm:$0xff]  ;;  %v357_v10 = vld [vmem:[#allocation2 + $0x28] sm:$0xff]  ;;  %v356_v11 = vld [vmem:[#allocation2 + $0x20] sm:$0xff]  ;;  %s465_s20 = smov [#allocation7]   ;;  %s273_s24 = sshll.u32 %s549_s7, 4  ;;  %s274_s24 = int_to_ptr.hbm [resolvable:$true] %s273_s24 }
   0xf   :  { %v77_v6 = vand.u32 %v75_v2, %v63_v3  ;;  %v355_v12 = vld [vmem:[#allocation2 + $0x18] sm:$0xff]  ;;  %v354_v13 = vld [vmem:[#allocation2 + $0x10] sm:$0xff]  ;;  %v353_v14 = vld [vmem:[#allocation2 + $0x8] sm:$0xff]  ;;  %s271_s21 = sshll.u32 %s465_s20, 4  ;;  %s272_s21 = int_to_ptr.vmem [resolvable:$true] %s271_s21 }
  0x10   :  { %v352_v15 = vld [vmem:[#allocation2] sm:$0xff]  ;;  %v367_v16 = vld [vmem:[#allocation5 + $0x38] sm:$0xff]  ;;  %v366_v17 = vld [vmem:[#allocation5 + $0x30] sm:$0xff] }
  0x11   :  { %86 = vmatpush.bf16.msra.mxu0 %v77_v6  ;;  %249 = vmatpush.bf16.msra.mxu2 %v367_v16  ;;  %v365_v18 = vld [vmem:[#allocation5 + $0x28] sm:$0xff]  ;;  %v364_v19 = vld [vmem:[#allocation5 + $0x20] sm:$0xff]  ;;  %v363_v28 = vld [vmem:[#allocation5 + $0x18] sm:$0xff] }
  0x12   :  { %165 = vmatpush.bf16.msra.mxu1 %v358_v9  ;;  %v379_v21 = vld [vmem:[%s544_s2] ss:$0 sm:$0xff]  ;;  %v362_v29 = vld [vmem:[#allocation5 + $0x10] sm:$0xff]  ;;  %v361_v30 = vld [vmem:[#allocation5 + $0x8] sm:$0xff] }
  0x13   :  { %v360_v31 = vld [vmem:[#allocation5] sm:$0xff] }
  0x14   :  { %287 = vmatmul.msk.bf16.vlgmr.msra.gmra.mxu0 %vm68_vm2, %v62_v8  ;;  %v380_v33 = vld [vmem:[%s546_s4] ss:$0 sm:$0xff] }
  0x15   :  { %250 = vmatpush.bf16.msra.mxu2 %v366_v17  ;;  %v381_v41 = vld [vmem:[%s548_s6] ss:$0 sm:$0xff] }
  0x16   :  { %166 = vmatpush.bf16.msra.mxu1 %v357_v10 }
  0x19   :  { %251 = vmatpush.bf16.msra.mxu2 %v365_v18 }
  0x1a   :  { %167 = vmatpush.bf16.msra.mxu1 %v356_v11 }
  0x1d   :  { %252 = vmatpush.bf16.msra.mxu2 %v364_v19 }
  0x1e   :  { %168 = vmatpush.bf16.msra.mxu1 %v355_v12 }
  0x21   :  { %253 = vmatpush.bf16.msra.mxu2 %v363_v28 }
  0x22   :  { %169 = vmatpush.bf16.msra.mxu1 %v354_v13 }
  0x25   :  { %254 = vmatpush.bf16.msra.mxu2 %v362_v29 }
  0x26   :  { %170 = vmatpush.bf16.msra.mxu1 %v353_v14 }
  0x29   :  { %255 = vmatpush.bf16.msra.mxu2 %v361_v30 }
  0x2a   :  { %171 = vmatpush.bf16.msra.mxu1 %v352_v15 }
  0x2d   :  { %256 = vmatpush.bf16.msra.mxu2 %v360_v31 }
  0x91   :  { %v88_v20 = vpop.f32.mrf.mxu0 }
  0x92   :  { %v89_v22 = vadd.f32 %v379_v21, %v88_v20 }
  0x94   :  { %v93_v25 = vmax.f32 %v89_v22, 0.0 }
  0x99   :  { %v90_v23 = vpop.f32.mrf.mxu0 }
  0x9a   :  { %v91_v24 = vadd.f32 %v379_v21, %v90_v23 }
  0x9c   :  { %v94_v26 = vmax.f32 %v91_v24, 0.0 }
  0x9e   :  { %v95_v27 = vpack.c.bf16 %v94_v26, %v93_v25 }
  0xa0   :  { %172 = vmatmul.bf16.vlgmr.msra.gmra.mxu1 %v95_v27 }
 0x11d   :  { %v173_v32 = vpop.f32.mrf.mxu1 }
 0x11e   :  { %v174_v34 = vadd.f32 %v380_v33, %v173_v32 }
 0x120   :  { %v178_v37 = vmax.f32 %v174_v34, 0.0 }
 0x125   :  { %v175_v35 = vpop.f32.mrf.mxu1 }
 0x126   :  { %v176_v36 = vadd.f32 %v380_v33, %v175_v35 }
 0x128   :  { %v179_v38 = vmax.f32 %v176_v36, 0.0 }
 0x12a   :  { %v180_v39 = vpack.c.bf16 %v179_v38, %v178_v37 }
 0x12c   :  { %257 = vmatmul.bf16.vlgmr.msra.gmra.mxu2 %v180_v39 }
 0x1af   :  { %v258_v40 = vpop.f32.mrf.mxu2 }
 0x1b0   :  { %v259_v43 = vadd.f32 %v381_v41, %v258_v40 }
 0x1b7   :  { %v260_v42 = vpop.f32.mrf.mxu2 }
 0x1b8   :  { %v261_v44 = vadd.f32 %v381_v41, %v260_v42 }
 0x1ba   :  { %v371_v45 = vpack.c.bf16 %v261_v44, %v259_v43 }
 0x1bc   :  { %372 = vst [vmem:[#allocation7] sm:$0xff] %v371_v45  }
 0x1bd   :  { %279 = dma.vmem_to_hbm [thread:$0]  %s272_s21, 128, %s274_s24, [#allocation4], %s461_s9, %s461_s9, %s462_s10  }
 0x1be   :  { %458 = dma.done.wait [#allocation4], 128  }
 0x1bf   :  { %459 = vsyncadd [#allocation4], 4294967168 }
 0x1c0   :  { %284 = vsyncpa [#allocation3], 1 }
 0x1c1   :  { %285 = vsyncpa [#allocation6], 1 }
 0x1c2   :  { %286 = vsyncpa [#allocation4], 1 }

</bundles_post_ra>
